<compile_context>
chip_gen: v7x
topology: tpu7x:2x2x1
jax: 0.10.0
libtpu: 0.0.40
codegen_flags: <defaults>
</compile_context>

<pallas_src>
import math

import jax
import jax.numpy as jnp
from jax.experimental import pallas as pl
from jax.experimental.pallas import tpu as pltpu


def _gaussian_1d(size, std):
    mean = (size - 1) / 2.0
    x = jnp.arange(size, dtype=jnp.float32)
    return (1.0 / (std * math.sqrt(2.0 * math.pi))) * jnp.exp(
        -(((x - mean) / std) ** 2) / 2.0
    )


def make_gaussian_filters(channels, kernel_size, sigma, dim=3):
    """Matches GaussianSmoothing.__init__.

    Returns:
      taps:   list of `dim` normalized 1-D tap vectors whose outer product equals the
              module's normalized dense kernel (sum of a separable product factorizes).
      weight: dense (C, 1, Kd, Kh, Kw) depthwise weight (for the XLA reference conv).
      ksize:  tuple of kernel sizes.
    """
    if isinstance(kernel_size, (int, float)):
        kernel_size = [int(kernel_size)] * dim
    if isinstance(sigma, (int, float)):
        sigma = [float(sigma)] * dim
    g = [_gaussian_1d(k, s) for k, s in zip(kernel_size, sigma)]
    dense = g[0][:, None, None] * g[1][None, :, None] * g[2][None, None, :]
    dense = dense / jnp.sum(dense)                 # module-exact dense kernel
    taps = [gi / jnp.sum(gi) for gi in g]          # separable form of the same kernel
    weight = jnp.broadcast_to(dense, (channels, 1) + dense.shape)
    return taps, weight, tuple(int(k) for k in kernel_size)


def _tree_sum(parts):
    """Pairwise reduction -> independent partial accumulators (fills VALU slots)."""
    parts = list(parts)
    while len(parts) > 1:
        nxt = [parts[i] + parts[i + 1] for i in range(0, len(parts) - 1, 2)]
        if len(parts) % 2:
            nxt.append(parts[-1])
        parts = nxt
    return parts[0]


def _round_up(x, m):
    return ((x + m - 1) // m) * m


def _pick_vmem_limit(block_bytes):
    """Per-generation scoped-VMEM limit: generous, clamped to ~3/4 of physical VMEM."""
    need = 12 * block_bytes + (8 << 20)   # 2x(in)+2x(out) blocks + pass temporaries + slack
    try:
        cap = pltpu.get_tpu_info().vmem_capacity_bytes
    except Exception:
        cap = 64 << 20                    # conservative fallback (v7x-sized)
    return int(min(max(32 << 20, need), int(cap * 3 / 4)))


def gaussian_smoothing_3d(x, taps, kernel_size):
    """Depthwise 3-D Gaussian conv with 'same' zero padding via a Pallas kernel.

    x:    (N, C, D, H, W) float32
    taps: [wd (Kd,), wh (Kh,), ww (Kw,)] normalized 1-D Gaussian taps (shared across
          channels, as in the PyTorch module).
    """
    N, C, D, H, W = x.shape
    Kd, Kh, Kw = kernel_size
    HW = H * W
    NC = N * C
    # 'same' left pad = floor((K-1)/2) -- matches torch padding='same' and XLA "SAME"
    # for stride 1 (symmetric for the usual odd-K Gaussian).
    pd, ph, pw = (Kd - 1) // 2, (Kh - 1) // 2, (Kw - 1) // 2

    # Tile-aligned zero-extension widths (sublane axis: multiples of 8; lane axis:
    # multiples of 128) so every in-kernel concatenate is aligned.
    DPAD = _round_up(max(pd, Kd - 1 - pd, 1), 8)
    LPAD = _round_up(max(ph * W, (Kh - 1 - ph) * W, pw, Kw - 1 - pw, 1), 128)

    # D/H taps: shared scalars in SMEM (scalar * vector multiplies in-kernel).
    taps_dh = jnp.concatenate(
        [taps[0].astype(jnp.float32), taps[1].astype(jnp.float32)]
    )  # (Kd + Kh,)

    # W-pass tap vectors with the per-row validity mask folded in:
    #   wtap[kw, 0, h*W + w] = ww[kw] if 0 <= w + kw - pw < W else 0
    # This kills the cross-row bleed of small lane shifts in the flattened H*W axis at
    # zero extra cost (we multiply by the tap anyway).  Tiny, VMEM-resident constant.
    w_idx = jnp.arange(HW, dtype=jnp.int32) % W
    off = jnp.arange(Kw, dtype=jnp.int32)[:, None] - pw
    valid = ((w_idx[None, :] + off) >= 0) & ((w_idx[None, :] + off) < W)
    wtap = (taps[2].astype(jnp.float32)[:, None] * valid.astype(jnp.float32))
    wtap = wtap[:, None, :]  # (Kw, 1, HW)

    # Free reshape: channels fold into the (parallel) grid axis, H*W lands on lanes.
    xr = x.reshape(NC, D, HW)

    def kernel(taps_ref, wtap_ref, x_ref, o_ref):
        xv = x_ref[...].astype(jnp.float32)                       # (D, HW)

        # ---- D pass: zero-extend along sublanes, statically shifted row slices ----
        zrow = jnp.zeros((DPAD, HW), jnp.float32)
        xe = jnp.concatenate([zrow, xv, zrow], axis=0)            # (D + 2*DPAD, HW)
        t = _tree_sum(
            [taps_ref[kd] * xe[DPAD - pd + kd: DPAD - pd + kd + D, :]
             for kd in range(Kd)]
        )                                                         # (D, HW)

        # ---- H pass: zero-extend along lanes; shifts are multiples of W -----------
        zlane = jnp.zeros((D, LPAD), jnp.float32)
        te = jnp.concatenate([zlane, t, zlane], axis=1)           # (D, HW + 2*LPAD)
        t = _tree_sum(
            [taps_ref[Kd + kh]
             * te[:, LPAD + (kh - ph) * W: LPAD + (kh - ph) * W + HW]
             for kh in range(Kh)]
        )                                                         # (D, HW)

        # ---- W pass: +-(Kw-1) lane shifts; mask*tap folded into wtap --------------
        te = jnp.concatenate([zlane, t, zlane], axis=1)           # (D, HW + 2*LPAD)
        t = _tree_sum(
            [wtap_ref[kw] * te[:, LPAD + (kw - pw): LPAD + (kw - pw) + HW]
             for kw in range(Kw)]
        )                                                         # (D, HW)

        # Single, lane-dense store of the whole output block.
        o_ref[...] = t.astype(o_ref.dtype)

    block_bytes = D * HW * 4
    out = pl.pallas_call(
        kernel,
        out_shape=jax.ShapeDtypeStruct((NC, D, HW), x.dtype),
        grid=(NC,),
        in_specs=[
            # Shared 1-D taps for the D/H passes, resident in SMEM (scalar reads).
            pl.BlockSpec(memory_space=pltpu.MemorySpace.SMEM),
            # Masked W taps, constant block index -> resident in VMEM for all steps.
            pl.BlockSpec((Kw, 1, HW), lambda i: (0, 0, 0)),
            # One (D, H*W) per-channel volume per grid step, H*W on lanes.
            pl.BlockSpec((None, D, HW), lambda i: (i, 0, 0)),
        ],
        out_specs=pl.BlockSpec((None, D, HW), lambda i: (i, 0, 0)),
        compiler_params=pltpu.CompilerParams(
            dimension_semantics=("parallel",),
            vmem_limit_bytes=_pick_vmem_limit(block_bytes),
        ),
    )(taps_dh, wtap, xr)

    # Free reshape back to NCDHW.
    return out.reshape(N, C, D, H, W)


if __name__ == "__main__":
    # Small volumetric shapes: N=2, C=4, D=H=W=16, K=3 Gaussian.
    # (H*W = 256 -> lane-dense blocks; D = 16 -> sublane-aligned.)
    N, C, D, H, W = 2, 4, 16, 16, 16
    kernel_size = 3
    sigma = 1.0

    key = jax.random.PRNGKey(0)
    x = jax.random.normal(key, (N, C, D, H, W), dtype=jnp.float32)

    taps, dense_w, ksize = make_gaussian_filters(C, kernel_size, sigma, dim=3)

    out = gaussian_smoothing_3d(x, taps, ksize)
    out = jax.block_until_ready(out)

    # Reference: depthwise conv3d with 'same' padding (plain XLA).
    ref = jax.lax.conv_general_dilated(
        x,
        dense_w,
        window_strides=(1, 1, 1),
        padding="SAME",
        dimension_numbers=("NCDHW", "OIDHW", "NCDHW"),
        feature_group_count=C,
    )
    assert out.shape == (N, C, D, H, W)
    assert jnp.allclose(out, ref, atol=1e-5, rtol=1e-5)

    print("KERNEL_OK")
</pallas_src>

<mosaic_0001>
module attributes {stable_mosaic.version = 11 : i64} {
  func.func @kernel(%arg0: i32, %arg1: memref<6xf32, #tpu.memory_space<smem>>, %arg2: memref<3x1x256xf32, #tpu.memory_space<vmem>>, %arg3: memref<1x16x256xf32, #tpu.memory_space<vmem>>, %arg4: memref<1x16x256xf32, #tpu.memory_space<vmem>>) attributes {dimension_semantics = [#tpu.dimension_semantics<parallel>], iteration_bounds = array<i64: 8>, scalar_prefetch = 0 : i64, scratch_operands = 0 : i64, tpu.core_type = #tpu.core_type<tc>, window_params = [{transform_indices = @transform_0, window_bounds = array<i64: 6>}, {pipeline_mode = #tpu.pipeline_mode<synchronous>, transform_indices = @transform_1, window_bounds = array<i64: 3, 1, 256>}, {transform_indices = @transform_2, window_bounds = array<i64: 1, 16, 256>}, {transform_indices = @transform_3, window_bounds = array<i64: 1, 16, 256>}]} {
    %c0 = arith.constant 0 : index
    %c0_0 = arith.constant 0 : index
    %c0_1 = arith.constant 0 : index
    %0 = vector.load %arg3[%c0, %c0_0, %c0_1] : memref<1x16x256xf32, #tpu.memory_space<vmem>>, vector<1x16x256xf32>
    %1 = vector.shape_cast %0 : vector<1x16x256xf32> to vector<16x256xf32>
    %cst = arith.constant 0.000000e+00 : f32
    %2 = vector.broadcast %cst : f32 to vector<8x256xf32>
    %3 = tpu.concatenate %2, %1, %2 in 0 : vector<8x256xf32>, vector<16x256xf32>, vector<8x256xf32> -> vector<32x256xf32>
    %c0_2 = arith.constant 0 : index
    %4 = memref.load %arg1[%c0_2] : memref<6xf32, #tpu.memory_space<smem>>
    %5 = vector.extract_strided_slice %3 {offsets = [7, 0], sizes = [16, 256], strides = [1, 1]} : vector<32x256xf32> to vector<16x256xf32>
    %6 = vector.broadcast %4 : f32 to vector<16x256xf32>
    %7 = arith.mulf %6, %5 : vector<16x256xf32>
    %c1 = arith.constant 1 : index
    %8 = memref.load %arg1[%c1] : memref<6xf32, #tpu.memory_space<smem>>
    %9 = vector.extract_strided_slice %3 {offsets = [8, 0], sizes = [16, 256], strides = [1, 1]} : vector<32x256xf32> to vector<16x256xf32>
    %10 = vector.broadcast %8 : f32 to vector<16x256xf32>
    %11 = arith.mulf %10, %9 : vector<16x256xf32>
    %c2 = arith.constant 2 : index
    %12 = memref.load %arg1[%c2] : memref<6xf32, #tpu.memory_space<smem>>
    %13 = vector.extract_strided_slice %3 {offsets = [9, 0], sizes = [16, 256], strides = [1, 1]} : vector<32x256xf32> to vector<16x256xf32>
    %14 = vector.broadcast %12 : f32 to vector<16x256xf32>
    %15 = arith.mulf %14, %13 : vector<16x256xf32>
    %16 = arith.addf %7, %11 : vector<16x256xf32>
    %17 = arith.addf %16, %15 : vector<16x256xf32>
    %cst_3 = arith.constant 0.000000e+00 : f32
    %18 = vector.broadcast %cst_3 : f32 to vector<16x128xf32>
    %19 = tpu.concatenate %18, %17, %18 in 1 : vector<16x128xf32>, vector<16x256xf32>, vector<16x128xf32> -> vector<16x512xf32>
    %c3 = arith.constant 3 : index
    %20 = memref.load %arg1[%c3] : memref<6xf32, #tpu.memory_space<smem>>
    %21 = vector.extract_strided_slice %19 {offsets = [0, 112], sizes = [16, 256], strides = [1, 1]} : vector<16x512xf32> to vector<16x256xf32>
    %22 = vector.broadcast %20 : f32 to vector<16x256xf32>
    %23 = arith.mulf %22, %21 : vector<16x256xf32>
    %c4 = arith.constant 4 : index
    %24 = memref.load %arg1[%c4] : memref<6xf32, #tpu.memory_space<smem>>
    %25 = vector.extract_strided_slice %19 {offsets = [0, 128], sizes = [16, 256], strides = [1, 1]} : vector<16x512xf32> to vector<16x256xf32>
    %26 = vector.broadcast %24 : f32 to vector<16x256xf32>
    %27 = arith.mulf %26, %25 : vector<16x256xf32>
    %c5 = arith.constant 5 : index
    %28 = memref.load %arg1[%c5] : memref<6xf32, #tpu.memory_space<smem>>
    %29 = vector.extract_strided_slice %19 {offsets = [0, 144], sizes = [16, 256], strides = [1, 1]} : vector<16x512xf32> to vector<16x256xf32>
    %30 = vector.broadcast %28 : f32 to vector<16x256xf32>
    %31 = arith.mulf %30, %29 : vector<16x256xf32>
    %32 = arith.addf %23, %27 : vector<16x256xf32>
    %33 = arith.addf %32, %31 : vector<16x256xf32>
    %34 = tpu.concatenate %18, %33, %18 in 1 : vector<16x128xf32>, vector<16x256xf32>, vector<16x128xf32> -> vector<16x512xf32>
    %c0_4 = arith.constant 0 : index
    %c0_5 = arith.constant 0 : index
    %c0_6 = arith.constant 0 : index
    %35 = vector.load %arg2[%c0_4, %c0_5, %c0_6] : memref<3x1x256xf32, #tpu.memory_space<vmem>>, vector<1x1x256xf32>
    %36 = vector.shape_cast %35 : vector<1x1x256xf32> to vector<1x256xf32>
    %37 = vector.extract_strided_slice %34 {offsets = [0, 127], sizes = [16, 256], strides = [1, 1]} : vector<16x512xf32> to vector<16x256xf32>
    %38 = vector.broadcast %36 : vector<1x256xf32> to vector<16x256xf32>
    %39 = arith.mulf %38, %37 : vector<16x256xf32>
    %c1_7 = arith.constant 1 : index
    %c0_8 = arith.constant 0 : index
    %c0_9 = arith.constant 0 : index
    %40 = vector.load %arg2[%c1_7, %c0_8, %c0_9] : memref<3x1x256xf32, #tpu.memory_space<vmem>>, vector<1x1x256xf32>
    %41 = vector.shape_cast %40 : vector<1x1x256xf32> to vector<1x256xf32>
    %42 = vector.extract_strided_slice %34 {offsets = [0, 128], sizes = [16, 256], strides = [1, 1]} : vector<16x512xf32> to vector<16x256xf32>
    %43 = vector.broadcast %41 : vector<1x256xf32> to vector<16x256xf32>
    %44 = arith.mulf %43, %42 : vector<16x256xf32>
    %c2_10 = arith.constant 2 : index
    %c0_11 = arith.constant 0 : index
    %c0_12 = arith.constant 0 : index
    %45 = vector.load %arg2[%c2_10, %c0_11, %c0_12] : memref<3x1x256xf32, #tpu.memory_space<vmem>>, vector<1x1x256xf32>
    %46 = vector.shape_cast %45 : vector<1x1x256xf32> to vector<1x256xf32>
    %47 = vector.extract_strided_slice %34 {offsets = [0, 129], sizes = [16, 256], strides = [1, 1]} : vector<16x512xf32> to vector<16x256xf32>
    %48 = vector.broadcast %46 : vector<1x256xf32> to vector<16x256xf32>
    %49 = arith.mulf %48, %47 : vector<16x256xf32>
    %50 = arith.addf %39, %44 : vector<16x256xf32>
    %51 = arith.addf %50, %49 : vector<16x256xf32>
    %c0_13 = arith.constant 0 : index
    %c0_14 = arith.constant 0 : index
    %c0_15 = arith.constant 0 : index
    %52 = vector.load %arg4[%c0_13, %c0_14, %c0_15] : memref<1x16x256xf32, #tpu.memory_space<vmem>>, vector<1x16x256xf32>
    %53 = vector.shape_cast %52 : vector<1x16x256xf32> to vector<16x256xf32>
    %54 = vector.shape_cast %51 : vector<16x256xf32> to vector<1x16x256xf32>
    tpu.vector_store %arg4[%c0_13, %c0_14, %c0_15], %54 {strides = array<i32>} : memref<1x16x256xf32, #tpu.memory_space<vmem>>, vector<1x16x256xf32>,
    return
  }
  func.func @transform_0(%arg0: i32) -> i32 {
    %c0_i32 = arith.constant 0 : i32
    %c0_i32_0 = arith.constant 0 : i32
    return %c0_i32 : i32
  }
  func.func @transform_1(%arg0: i32) -> (i32, i32, i32) {
    %c0_i32 = arith.constant 0 : i32
    %c0_i32_0 = arith.constant 0 : i32
    %c0_i32_1 = arith.constant 0 : i32
    %c0_i32_2 = arith.constant 0 : i32
    return %c0_i32, %c0_i32_0, %c0_i32_1 : i32, i32, i32
  }
  func.func @transform_2(%arg0: i32) -> (i32, i32, i32) {
    %c0_i32 = arith.constant 0 : i32
    %c0_i32_0 = arith.constant 0 : i32
    %c0_i32_1 = arith.constant 0 : i32
    return %arg0, %c0_i32, %c0_i32_0 : i32, i32, i32
  }
  func.func @transform_3(%arg0: i32) -> (i32, i32, i32) {
    %c0_i32 = arith.constant 0 : i32
    %c0_i32_0 = arith.constant 0 : i32
    %c0_i32_1 = arith.constant 0 : i32
    return %arg0, %c0_i32, %c0_i32_0 : i32, i32, i32
  }
}

</mosaic_0001>

<bundles_post_ra>
// kernel: tpu_custom_call.1
= control target key start
LH: loop header
LB: loop body
LE: loop exit
PB: predicated region body
PF: predicated region fallthrough
CT: control target
= control target key end

     0   :  { %8 = vsyncpa [#allocation5], 0  ;;  %s1179_s0 = inlined_call_operand.hbm [shape: f32[6], index: 0, kind: input, shape index: {}]   ;;  %s1180_s1 = inlined_call_operand.hbm [shape: f32[3,1,256], index: 1, kind: input, shape index: {}]   ;;  %s1181_s2 = inlined_call_operand.hbm [shape: f32[8,16,256], index: 2, kind: input, shape index: {}]   ;;  %s1182_s3 = inlined_call_operand.hbm [shape: f32[8,16,256], index: 3, kind: output, shape index: {}]  }
   0x1   :  { %9 = vsyncpa [#allocation3], 0 }
   0x2   :  { %10 = vsyncpa [#allocation8], 0 }
   0x3   :  { %12 = vsyncpa [#allocation8 + $0x1], 0 }
   0x4   :  { %13 = vsyncpa [#allocation4], 0 }
   0x5   :  { %15 = vsyncpa [#allocation4 + $0x1], 0  ;;  %s914_s12 = smov 0   ;;  %s916_s13 = smov 0  }
   0x6   :  { %s918_s14 = smov 0   ;;  %s920_s15 = smov 0  }
   0x7 LB: > { %s935_s16 = sadd.s32 4294967295, %s877_s15   ;;  %s629_s17 = sadd.s32 4294967294, %s877_s15   ;;  %s877_s15 = sphi %s920_s15, %s1206_s15   ;;  %s873_s14 = sphi %s918_s14, %s1205_s14   ;;  %s869_s13 = sphi %s916_s13, %s1204_s13   ;;  %s865_s12 = sphi %s914_s12, %s1203_s12  }
   0x8   : > { %s939_s18 = sadd.s32 1, %s877_s15   ;;  %s70_s19 = sadd.s32 1, %s873_s14 }
   0x9   : > { %s67_s20 = ssub.s32 %s877_s15, %s939_s18  ;;  %p77_p0 = scmp.ne.s32.totalorder %s873_s14, %s869_s13 }
   0xa   : > { %p68_p1 = scmp.eq.s32.totalorder %s67_s20, 0  ;;  %p78_p2 = scmp.eq.s32.totalorder %s877_s15, 0 }
   0xb   : > { %p83_p3 = scmp.ne.s32.totalorder %s869_s13, %s865_s12  ;;  %p1184_p4 = scmp.eq.s32.totalorder %s935_s16, 0 }
   0xc   : > { %s951_s21 = scalar_select %p68_p1, %s873_s14, %s70_s19  }
   0xd   : > { %p79_p5 = por %p78_p2, %p77_p0  ;;  %p955_p6 = por %p1184_p4, %p83_p3 }
   0xe   : > { %p107_p7 = scmp.eq.s32.totalorder %s935_s16, 7  ;;  %p113_p8 = scmp.eq.s32.totalorder %s629_s17, 7 }
   0xf   : > { %s1188_s22 = scalar_select %p955_p6, 1, 0 }
  0x10   : > { %p630_p9 = scmp.ge.s32.totalorder %s877_s15, 1  ;;  %p120_p10 = scmp.lt.s32.totalorder %s877_s15, 9 }
  0x11   : > { %p962_p11 = por %p107_p7, %p77_p0  ;;  %p966_p12 = por %p113_p8, %p83_p3 }
  0x12   : > { %p970_p13 = pnand %p630_p9, %p120_p10  ;;  %p683_p2 = scmp.lt.s32.totalorder %s877_s15, 8 }
  0x13   : > { %s1189_s23 = scalar_select %p962_p11, 1, 0 }
  0x14   : > { %s1190_s24 = scalar_select %p966_p12, 1, 0 }
  0x15   : > { %s1191_s25 = scalar_select %p970_p13, 1, 0 }
  0x16   : > { %p666_p1 = pneg %p970_p13  ;;  %p983_p0 = pnand %p683_p2, %p79_p5 }
  0x17   : > { %s879_s28 = smov [#allocation6]   ;;  %s732_s5 = scalar_lea.hbm %s1179_s0, 16 }
  0x18   : > { %p979_p6 = pnand %p666_p1, %p1184_p4  ;;  %s141_s29 = sshll.u32 %s879_s28, 4  ;;  %s142_s29 = int_to_ptr.vmem [resolvable:$true] %s141_s29 }
  0x19   : > { %s1193_s27 = scalar_select %p983_p0, 1, 0 }
  0x1a   : > { %p733_p3 = scmp.ne.s32.totalorder %s1179_s0, %s732_s5  ;;  %p734_p7 = pneg %p979_p6 }
  0x1b   : > { %p739_p5 = scmp.lt.u32.totalorder %s732_s5, %s1179_s0 }
  0x1c   : > { %p735_p8 = pnand %p734_p7, %p733_p3 }
  0x1e   : > { %p736_p9 = pneg %p735_p8 }
  0x20   : > { %p741_p10 = pnand %p739_p5, %p736_p9 }
  0x22   : > { %744 = shalt.err (!%p741_p10)
}
  0x23   : > { %s880_s10 = smov [#allocation2]   ;;  %s155_s19 = sand.u32 1, %s873_s14  }
  0x24   : > { %669 = dma.hbm_to_smem (!%p979_p6), %s1179_s0, 16, %s880_s10, [#allocation5]  }
  0x25   : > { %s745_s30 = scalar_lea.hbm %s1180_s1, 96 }
  0x26   : > { %p746_p1 = scmp.ne.s32.totalorder %s1180_s1, %s745_s30  ;;  %p752_p8 = scmp.lt.u32.totalorder %s745_s30, %s1180_s1 }
  0x28   : > { %p748_p2 = pnand %p746_p1, %p734_p7 }
  0x2a   : > { %p749_p3 = pneg %p748_p2 }
  0x2c   : > { %p754_p9 = pnand %p752_p8, %p749_p3 }
  0x2e   : > { %757 = shalt.err (!%p754_p9)
}
  0x2f   : > { %s758_s8 = scalar_lea.vmem %s142_s29, 96  ;;  %p766_p12 = scmp.lt.s32.totalorder %s142_s29, %s142_s29 }
  0x30   : > { %p759_p5 = scmp.ne.s32.totalorder %s142_s29, %s758_s8  ;;  %p767_p11 = scmp.lt.s32.totalorder %s758_s8, %s758_s8 }
  0x32   : > { %p761_p10 = pnand %p759_p5, %p734_p7  ;;  %p768_p13 = por %p767_p11, %p766_p12 }
  0x34   : > { %p762_p4 = pneg %p761_p10 }
  0x36   : > { %p769_p0 = pnand %p768_p13, %p762_p4 }
  0x38   : > { %772 = shalt.err (!%p769_p0)
}
  0x39   : > { %s881_s9 = smov 32   ;;  %s882_s10 = smov 2  }
  0x3a   : > { %672 = dma.hbm_to_vmem [thread:$0]  (!%p979_p6), %s1180_s1, 96, %s142_s29, [#allocation3], %s881_s9, %s881_s9, %s882_s10  }
  0x3b   : > { %s634_s20 = sshll.u32 %s155_s19, 5  ;;  %s652_s28 = sshll.u32 %s877_s15, 9 }
  0x3c   : > { %s1031_s6 = scalar_lea.hbm %s1181_s2, %s652_s28  ;;  %s159_s5 = scalar_lea.vmem [#allocation7], %s634_s20 }
  0x3d   : > { %s166_s7 = sshll.u32 %s159_s5, 4  ;;  %s1035_s26 = scalar_lea.sflag [#allocation8], %s155_s19  ;;  %s1033_s7 = int_to_ptr.vmem [resolvable:$true] %s166_s7 }
  0x3e   : > { %s773_s8 = scalar_lea.hbm %s1031_s6, 512  ;;  %p1194_p6 = scmp.ne.s32.totalorder %s1193_s27, 0 }
  0x3f   : > { %p774_p4 = scmp.ne.s32.totalorder %s1031_s6, %s773_s8  ;;  %s778_s10 = scalar_lea.hbm %s1181_s2, 4096 }
  0x40   : > { %p775_p11 = pneg %p1194_p6  ;;  %p779_p0 = scmp.lt.u32.totalorder %s1031_s6, %s1181_s2 }
  0x41   : > { %p780_p7 = scmp.lt.u32.totalorder %s778_s10, %s773_s8  ;;  %p782_p2 = scmp.lt.u32.totalorder %s773_s8, %s1031_s6 }
  0x42   : > { %p776_p12 = pnand %p775_p11, %p774_p4 }
  0x43   : > { %p781_p1 = por %p780_p7, %p779_p0 }
  0x44   : > { %p777_p13 = pneg %p776_p12 }
  0x45   : > { %p783_p3 = por %p782_p2, %p781_p1 }
  0x47   : > { %p784_p8 = pnand %p783_p3, %p777_p13 }
  0x49   : > { %787 = shalt.err (!%p784_p8)
}
  0x4a   : > { %s788_s19 = scalar_lea.vmem %s1033_s7, 512  ;;  %s883_s20 = smov [#allocation7]  }
  0x4b   : > { %p789_p9 = scmp.ne.s32.totalorder %s1033_s7, %s788_s19  ;;  %s793_s28 = sshll.u32 %s883_s20, 4  ;;  %s794_s28 = int_to_ptr.vmem [resolvable:$false] %s793_s28 }
  0x4c   : > { %s795_s30 = scalar_lea.vmem %s794_s28, 1024  ;;  %p796_p4 = scmp.lt.s32.totalorder %s1033_s7, %s794_s28 }
  0x4d   : > { %p791_p5 = pnand %p789_p9, %p775_p11  ;;  %p797_p12 = scmp.lt.s32.totalorder %s795_s30, %s788_s19 }
  0x4f   : > { %p792_p10 = pneg %p791_p5  ;;  %p798_p0 = por %p797_p12, %p796_p4 }
  0x51   : > { %p799_p7 = pnand %p798_p0, %p792_p10 }
  0x53   : > { %802 = shalt.err (!%p799_p7)
}
  0x54   : > { %s884_s4 = smov 256   ;;  %s885_s5 = smov 16  }
  0x55   : > { %676 = dma.hbm_to_vmem [thread:$0]  (!%p1194_p6), %s1031_s6, 512, %s1033_s7, %s1035_s26, %s884_s4, %s884_s4, %s885_s5  }
  0x56   : > { %p1195_p11 = scmp.ne.s32.totalorder %s1191_s25, 0 }
  0x57   : > { %p1196_p13 = scmp.eq.s32.totalorder (!%p1195_p11), %s935_s16, 0 }
  0x58   : > { %178 = sbr.rel (%p1195_p11) target bundleno = 525 (0x20d), region = 32 }
  0x5f   : > { %848 = dma.done.wait (%p1196_p13), [#allocation5], 16   ;;  %p1197_p1 = pmov %p1196_p13 }
  0x61   : > { %850 = vsyncadd (%p1197_p1), [#allocation5], 4294967280  ;;  %p1198_p2 = pmov %p1197_p1 }
  0x62   : > { %p1199_p3 = pmov %p1197_p1 }
  0x63   : > { %852 = dma.done.wait (%p1198_p2), [#allocation3], 96  }
  0x64   : > { %854 = vsyncadd (%p1199_p3), [#allocation3], 4294967200  ;;  %s1074_s8 = sand.u32 1, %s869_s13   ;;  %p1200_p6 = scmp.ne.s32.totalorder %s1188_s22, 0 }
  0x65   : > { %s640_s25 = sshll.u32 %s1074_s8, 5  ;;  %s189_s27 = scalar_lea.sflag [#allocation8], %s1074_s8 }
  0x66   : > { %s192_s6 = scalar_lea.vmem [#allocation7], %s640_s25 }
  0x67   : > { %856 = dma.done.wait (%p1200_p6), %s189_s27, 512  }
  0x68   : > { %858 = vsyncadd (%p1200_p6), %s189_s27, 4294966784 }
  0x69   : > { %197 = sfence }
  0x6a   : > { %s646_s7 = sld [smem:[#allocation2 + $0x5]]  ;;  %s220_s26 = sld [smem:[#allocation2]]  ;;  %v216_v0 = vld [vmem:[%s192_s6] sm:$0xff]  ;;  %v218_v1 = vld [vmem:[%s192_s6 + $0x10] sm:$0xff]  ;;  %vm244_vm0 = vcmask 1046528   ;;  %vm268_vm1 = vcmask 1045504  }
  0x6b   : > { %s642_s29 = sld [smem:[#allocation2 + $0x1]]  ;;  %s643_s9 = sld [smem:[#allocation2 + $0x2]]  ;;  %v217_v9 = vld [vmem:[%s192_s6 + $0x8] sm:$0xff]  ;;  %v219_v10 = vld [vmem:[%s192_s6 + $0x18] sm:$0xff]  ;;  %vm296_vm2 = vcmask 1040384   ;;  %vm373_vm3 = vcmask 785408  }
  0x6c   : > { %s1087_s22 = sld [smem:[#allocation2 + $0x4]]  ;;  %s886_s10 = smov 96   ;;  %vm343_vm4 = vcmask 916480   ;;  %vm408_vm5 = vcmask 130048   ;;  %vm440_vm6 = vcmask 7168   ;;  %vm493_vm7 = vcmask 1039360  }
  0x6d   : > { %s887_s11 = smov 112   ;;  %s644_s17 = sld [smem:[#allocation2 + $0x3]] }
  0x6e   : > { %s888_s19 = smov 16   ;;  %s890_s20 = smov 1  }
  0x6f   : > { %s891_s28 = smov 127   ;;  %s215_s30 = scalar_lea.vmem [#allocation9], %s640_s25 }
  0x70   : > { %v1084_v2 = vstv %s646_s7  ;;  %v221_v4 = vstv %s220_s26  ;;  %s532_s4 = sshll.u32 %s215_s30, 4  ;;  %s653_s5 = sshll.u32 %s935_s16, 9  ;;  %s1130_s4 = int_to_ptr.vmem [resolvable:$true] %s532_s4 }
  0x71   : > { %v328_v3 = vmul.f32 0.0, %v1084_v2  ;;  %v228_v5 = vstv %s642_s29  ;;  %v223_v6 = vmul.f32 %v221_v4, %v216_v0  ;;  %v225_v11 = vmul.f32 %v221_v4, %v218_v1  ;;  %s1135_s6 = scalar_lea.hbm %s1182_s3, %s653_s5  ;;  %s519_s16 = scalar_lea.sflag [#allocation4], %s1074_s8 }
  0x72   : > { %v229_v7 = vmul.f32 %v228_v5, %v216_v0  ;;  %v231_v8 = vmul.f32 %v228_v5, %v218_v1  ;;  %v234_v12 = vstv %s643_s9  ;;  %v222_v13 = vmul.f32 0.0, %v221_v4  ;;  %s803_s7 = scalar_lea.vmem %s1130_s4, 512  ;;  %p1201_p9 = scmp.ne.s32.totalorder %s1189_s23, 0 }
  0x73   : > { %367 = vrot.lane.b32.xlu0 %v328_v3, %s886_s10  ;;  %v224_v14 = vmul.f32 %v221_v4, %v217_v9  ;;  %v235_v15 = vmul.f32 %v234_v12, %v216_v0  ;;  %v237_v16 = vmul.f32 %v234_v12, %v218_v1  ;;  %v239_v17 = vmul.f32 0.0, %v234_v12  ;;  %p804_p8 = scmp.ne.s32.totalorder %s1130_s4, %s803_s7  ;;  %s892_s26 = smov [#allocation9]  }
  0x74   : > { %v245_v18 = vrot.slane %v229_v7, 1  ;;  %v247_v19 = vrot.slane %v231_v8, 1  ;;  %v226_v20 = vmul.f32 %v221_v4, %v219_v10  ;;  %v230_v21 = vmul.f32 %v228_v5, %v217_v9  ;;  %s807_s29 = sshll.u32 %s892_s26, 4  ;;  %s808_s29 = int_to_ptr.vmem [resolvable:$false] %s807_s29 }
  0x75   : > { %v232_v22 = vmul.f32 %v228_v5, %v219_v10  ;;  %v269_v23 = vrot.slane %v235_v15, 2  ;;  %v271_v24 = vrot.slane %v237_v16, 2  ;;  %v275_v25 = vrot.slane %v239_v17, 2  ;;  %p805_p5 = pnand %p804_p8, %p1201_p9  ;;  %s809_s9 = scalar_lea.vmem %s808_s29, 1024 }
  0x76   : > { %v257_v26 = vadd.f32 %v245_v18, %v222_v13  ;;  %v248_v27 = vsel %vm244_vm0, %v245_v18, %v247_v19  ;;  %v261_v28 = vadd.f32 %v247_v19, %v225_v11  ;;  %v236_v29 = vmul.f32 %v234_v12, %v217_v9  ;;  %p810_p4 = scmp.lt.s32.totalorder %s1130_s4, %s808_s29  ;;  %p811_p12 = scmp.lt.s32.totalorder %s809_s9, %s803_s7 }
  0x77   : > { %v238_v30 = vmul.f32 %v234_v12, %v219_v10  ;;  %v259_v31 = vadd.f32 %v248_v27, %v223_v6  ;;  %v272_v32 = vsel %vm268_vm1, %v269_v23, %v271_v24  ;;  %v276_v33 = vsel %vm268_vm1, %v271_v24, %v275_v25  ;;  %p806_p10 = pneg %p805_p5 }
  0x78   : > { %v284_v34 = vadd.f32 %v269_v23, %v257_v26  ;;  %v288_v35 = vadd.f32 %v276_v33, %v261_v28  ;;  %v246_v36 = vrot.slane %v230_v21, 1  ;;  %v249_v37 = vrot.slane %v232_v22, 1  ;;  %p812_p0 = por %p811_p12, %p810_p4 }
  0x79   : > { %v270_v38 = vrot.slane %v236_v29, 2  ;;  %v286_v39 = vadd.f32 %v272_v32, %v259_v31  ;;  %v319_v40 = vstv %s1087_s22  ;;  %v273_v42 = vrot.slane %v238_v30, 2 }
  0x7a   : > { %v297_v41 = vrot.slane %v284_v34, 7  ;;  %v303_v43 = vrot.slane %v288_v35, 7  ;;  %v250_v44 = vsel %vm244_vm0, %v246_v36, %v249_v37  ;;  %v262_v45 = vadd.f32 %v249_v37, %v226_v20  ;;  %p813_p7 = pnand %p812_p0, %p806_p10 }
  0x7b   : > { %v258_v46 = vadd.f32 %v246_v36, %v222_v13  ;;  %v298_v47 = vrot.slane %v286_v39, 7  ;;  %v260_v48 = vadd.f32 %v250_v44, %v224_v14  ;;  %v274_v49 = vsel %vm268_vm1, %v270_v38, %v273_v42 }
  0x7c   : > { %v277_v50 = vsel %vm268_vm1, %v273_v42, %v275_v25  ;;  %v312_v9 = vstv %s644_s17 }
  0x7d   : > { %v289_v51 = vadd.f32 %v277_v50, %v262_v45  ;;  %v285_v52 = vadd.f32 %v270_v38, %v258_v46  ;;  %v304_v53 = vsel %vm296_vm2, %v298_v47, %v303_v43  ;;  %v299_v54 = vsel %vm296_vm2, %v297_v41, %v298_v47 }
  0x7e   : > { %v287_v55 = vadd.f32 %v274_v49, %v260_v48  ;;  %v322_v56 = vmul.f32 %v319_v40, %v304_v53  ;;  %v320_v57 = vmul.f32 %v319_v40, %v299_v54  ;;  %v326_v3 = vmul.f32 %v1084_v2, %v299_v54 }
  0x7f   : > { %v305_v58 = vrot.slane %v289_v51, 7  ;;  %v300_v59 = vrot.slane %v285_v52, 7  ;;  %v329_v4 = vmul.f32 %v1084_v2, %v304_v53  ;;  %v313_v12 = vmul.f32 0.0, %v312_v9 }
  0x80   : > { %v301_v60 = vrot.slane %v287_v55, 7  ;;  %339 = vrot.lane.b32.xlu1 %v322_v56, %s887_s11  ;;  %335 = vrot.lane.b32.xlu0 %v320_v57, %s887_s11  ;;  %v316_v20 = vmul.f32 %v312_v9, %v304_v53  ;;  %v314_v21 = vmul.f32 %v312_v9, %v299_v54  ;;  %v889_v38 = vmov 0.0   ;;  %v417_v53 = vld [vmem:[#allocation6] sm:$0x3]  ;;  %v454_v56 = vld [vmem:[#allocation6 + $0x2] sm:$0x3] }
  0x81   : > { %v419_v49 = vlaneseq }
  0x82   : > { %v306_v61 = vsel %vm296_vm2, %v301_v60, %v305_v58  ;;  %v302_v62 = vsel %vm296_vm2, %v300_v59, %v301_v60 }
  0x83   : > { %v323_v63 = vmul.f32 %v319_v40, %v306_v61  ;;  %v321_v0 = vmul.f32 %v319_v40, %v302_v62  ;;  %v327_v1 = vmul.f32 %v1084_v2, %v302_v62  ;;  %v330_v5 = vmul.f32 %v1084_v2, %v306_v61 }
  0x84   : > { %v315_v13 = vmul.f32 %v312_v9, %v302_v62  ;;  %v317_v30 = vmul.f32 %v312_v9, %v306_v61  ;;  %v420_v52 = vshrl.u32 %v419_v49, 7 }
  0x85   : > { %341 = vrot.lane.b32.xlu1 %v323_v63, %s887_s11  ;;  %337 = vrot.lane.b32.xlu0 %v321_v0, %s887_s11 }
  0x86   : > { %v425_v54 = vsub.s32 1, %v420_v52  ;;  %v421_v55 = vsub.s32 0, %v420_v52 }
  0x88   : > { %v422_v59 = vrot.slane %v417_v53, %v421_v55  ;;  %v426_v60 = vrot.slane %v417_v53, %v425_v54  ;;  %v463_v63 = vrot.slane %v454_v56, %v425_v54  ;;  %v459_v0 = vrot.slane %v454_v56, %v421_v55 }
  0x89   : > { %365 = vrot.lane.b32.xlu1 %v327_v1, %s886_s10  ;;  %363 = vrot.lane.b32.xlu0 %v326_v3, %s886_s10  ;;  %v471_v1 = vld [vmem:[#allocation6 + $0x4] sm:$0x3] }
  0x8d   : > { %369 = vrot.lane.b32.xlu1 %v329_v4, %s886_s10  ;;  %371 = vrot.lane.b32.xlu0 %v330_v5, %s886_s10 }
  0xe5   : > { %v368_v6 = vpop.permute.xlu0 %367 }
  0xf2   : > { %v340_v7 = vpop.permute.xlu1 %339  ;;  %v336_v8 = vpop.permute.xlu0 %335 }
  0xf3   : > { %v352_v14 = vadd.f32 %v336_v8, %v313_v12  ;;  %v355_v19 = vadd.f32 %v340_v7, %v313_v12 }
  0xf7   : > { %v342_v10 = vpop.permute.xlu1 %341  ;;  %v338_v11 = vpop.permute.xlu0 %337 }
  0xf8   : > { %v354_v17 = vadd.f32 %v338_v11, %v315_v13  ;;  %v345_v22 = vsel %vm343_vm4, %v340_v7, %v342_v10  ;;  %v344_v23 = vsel %vm343_vm4, %v336_v8, %v338_v11  ;;  %v357_v36 = vadd.f32 %v342_v10, %v317_v30 }
  0xf9   : > { %v356_v31 = vadd.f32 %v345_v22, %v316_v20  ;;  %v353_v32 = vadd.f32 %v344_v23, %v314_v21  ;;  %v480_v7 = vrot.slane %v471_v1, %v425_v54  ;;  %v476_v8 = vrot.slane %v471_v1, %v421_v55 }
  0xfb   : > { %v366_v15 = vpop.permute.xlu1 %365  ;;  %v364_v16 = vpop.permute.xlu0 %363 }
  0xfc   : > { %v384_v2 = vadd.f32 %v364_v16, %v352_v14  ;;  %v375_v18 = vsel %vm373_vm3, %v366_v15, %v368_v6  ;;  %v374_v28 = vsel %vm373_vm3, %v364_v16, %v366_v15 }
  0xfd   : > { %v386_v26 = vadd.f32 %v375_v18, %v354_v17  ;;  %v385_v33 = vadd.f32 %v374_v28, %v353_v32 }
  0xfe   : > { %396 = vrot.lane.b32.xlu1 %v384_v2, %s888_s19 }
  0xff   : > { %v370_v24 = vpop.permute.xlu1 %369  ;;  %v372_v25 = vpop.permute.xlu0 %371 }
 0x100   : > { %v387_v27 = vadd.f32 %v370_v24, %v355_v19  ;;  %v376_v29 = vsel %vm373_vm3, %v370_v24, %v372_v25  ;;  %v377_v35 = vsel %vm373_vm3, %v372_v25, %v368_v6 }
 0x101   : > { %v388_v34 = vadd.f32 %v376_v29, %v356_v31  ;;  %v389_v37 = vadd.f32 %v377_v35, %v357_v36 }
 0x102   : > { %402 = vrot.lane.b32.xlu0 %v387_v27, %s888_s19  ;;  %400 = vrot.lane.b32.xlu1 %v386_v26, %s888_s19 }
 0x106   : > { %404 = vrot.lane.b32.xlu1 %v388_v34, %s888_s19  ;;  %398 = vrot.lane.b32.xlu0 %v385_v33, %s888_s19 }
 0x10a   : > { %406 = vrot.lane.b32.xlu0 %v389_v37, %s888_s19  ;;  %430 = vrot.lane.b32.xlu1 %v889_v38, %s890_s20 }
 0x10e   : > { %487 = vrot.lane.b32.xlu0 %v889_v38, %s891_s28 }
 0x170   : > { %v397_v39 = vpop.permute.xlu1 %396 }
 0x174   : > { %v401_v40 = vpop.permute.xlu1 %400  ;;  %v403_v41 = vpop.permute.xlu0 %402 }
 0x178   : > { %v399_v42 = vpop.permute.xlu0 %398  ;;  %v405_v45 = vpop.permute.xlu1 %404 }
 0x179   : > { %v410_v43 = vsel %vm408_vm5, %v399_v42, %v401_v40  ;;  %v409_v44 = vsel %vm408_vm5, %v397_v39, %v399_v42  ;;  %v411_v47 = vsel %vm408_vm5, %v403_v41, %v405_v45 }
 0x17a   : > { %434 = vrot.lane.b32.xlu1 %v410_v43, %s890_s20  ;;  %432 = vrot.lane.b32.xlu0 %v409_v44, %s890_s20  ;;  %v467_v9 = vmul.f32 %v463_v63, %v410_v43  ;;  %v466_v10 = vmul.f32 %v459_v0, %v409_v44  ;;  %v468_v22 = vmul.f32 %v459_v0, %v411_v47 }
 0x17c   : > { %v407_v46 = vpop.permute.xlu0 %406  ;;  %v431_v50 = vpop.permute.xlu1 %430 }
 0x17d   : > { %v412_v48 = vsel %vm408_vm5, %v405_v45, %v407_v46 }
 0x17e   : > { %436 = vrot.lane.b32.xlu0 %v411_v47, %s890_s20  ;;  %438 = vrot.lane.b32.xlu1 %v412_v48, %s890_s20  ;;  %v469_v23 = vmul.f32 %v463_v63, %v412_v48 }
 0x180   : > { %v488_v51 = vpop.permute.xlu0 %487 }
 0x182   : > { %483 = vrot.lane.b32.xlu0 %v409_v44, %s891_s28  ;;  %485 = vrot.lane.b32.xlu1 %v410_v43, %s891_s28 }
 0x186   : > { %491 = vrot.lane.b32.xlu0 %v412_v48, %s891_s28  ;;  %489 = vrot.lane.b32.xlu1 %v411_v47, %s891_s28 }
 0x1ec   : > { %v435_v57 = vpop.permute.xlu1 %434  ;;  %v433_v58 = vpop.permute.xlu0 %432 }
 0x1ed   : > { %v441_v61 = vsel %vm440_vm6, %v431_v50, %v433_v58  ;;  %v442_v62 = vsel %vm440_vm6, %v433_v58, %v435_v57 }
 0x1ee   : > { %v449_v5 = vmul.f32 %v441_v61, %v422_v59  ;;  %v450_v6 = vmul.f32 %v442_v62, %v426_v60 }
 0x1f0   : > { %v439_v3 = vpop.permute.xlu1 %438  ;;  %v437_v4 = vpop.permute.xlu0 %436  ;;  %v506_v15 = vadd.f32 %v466_v10, %v449_v5  ;;  %v507_v16 = vadd.f32 %v467_v9, %v450_v6 }
 0x1f1   : > { %v443_v11 = vsel %vm440_vm6, %v431_v50, %v437_v4  ;;  %v444_v12 = vsel %vm440_vm6, %v437_v4, %v439_v3 }
 0x1f2   : > { %v451_v18 = vmul.f32 %v443_v11, %v422_v59  ;;  %v452_v19 = vmul.f32 %v444_v12, %v426_v60 }
 0x1f4   : > { %v486_v13 = vpop.permute.xlu1 %485  ;;  %v484_v14 = vpop.permute.xlu0 %483  ;;  %v508_v30 = vadd.f32 %v468_v22, %v451_v18  ;;  %v509_v31 = vadd.f32 %v469_v23, %v452_v19 }
 0x1f5   : > { %v495_v17 = vsel %vm493_vm7, %v486_v13, %v488_v51  ;;  %v494_v2 = vsel %vm493_vm7, %v484_v14, %v486_v13 }
 0x1f6   : > { %v503_v20 = vmul.f32 %v495_v17, %v480_v7  ;;  %v502_v21 = vmul.f32 %v494_v2, %v476_v8 }
 0x1f8   : > { %v511_v24 = vadd.f32 %v507_v16, %v503_v20  ;;  %v510_v25 = vadd.f32 %v506_v15, %v502_v21  ;;  %v490_v26 = vpop.permute.xlu1 %489  ;;  %v492_v27 = vpop.permute.xlu0 %491 }
 0x1f9   : > { %v496_v28 = vsel %vm493_vm7, %v490_v26, %v492_v27  ;;  %v497_v29 = vsel %vm493_vm7, %v492_v27, %v488_v51 }
 0x1fa   : > { %515 = vst [vmem:[%s215_s30 + $0x8] sm:$0xff] %v511_v24  ;;  %514 = vst [vmem:[%s215_s30] sm:$0xff] %v510_v25  ;;  %v504_v32 = vmul.f32 %v496_v28, %v476_v8  ;;  %v505_v33 = vmul.f32 %v497_v29, %v480_v7 }
 0x1fc   : > { %v512_v34 = vadd.f32 %v508_v30, %v504_v32  ;;  %v513_v35 = vadd.f32 %v509_v31, %v505_v33 }
 0x1fe   : > { %516 = vst [vmem:[%s215_s30 + $0x10] sm:$0xff] %v512_v34  ;;  %517 = vst [vmem:[%s215_s30 + $0x18] sm:$0xff] %v513_v35 }
 0x1ff   : > { %816 = shalt.err (!%p813_p7)
}
 0x200   : > { %s817_s22 = scalar_lea.hbm %s1135_s6, 512  ;;  %s821_s17 = scalar_lea.hbm %s1182_s3, 4096 }
 0x201   : > { %p818_p11 = scmp.ne.s32.totalorder %s1135_s6, %s817_s22  ;;  %p822_p2 = scmp.lt.u32.totalorder %s1135_s6, %s1182_s3 }
 0x202   : > { %p823_p3 = scmp.lt.u32.totalorder %s821_s17, %s817_s22  ;;  %p825_p8 = scmp.lt.u32.totalorder %s817_s22, %s1135_s6 }
 0x203   : > { %p819_p13 = pnand %p818_p11, %p1201_p9 }
 0x204   : > { %p824_p6 = por %p823_p3, %p822_p2 }
 0x205   : > { %p820_p1 = pneg %p819_p13 }
 0x206   : > { %p826_p5 = por %p825_p8, %p824_p6 }
 0x208   : > { %p827_p10 = pnand %p826_p5, %p820_p1 }
 0x20a   : > { %830 = shalt.err (!%p827_p10)
}
 0x20b   : > { %s893_s30 = smov 256  }
 0x20c   : > { %664 = dma.vmem_to_hbm [thread:$0]  (%p1201_p9), %s1130_s4, 512, %s1135_s6, %s519_s16, %s893_s30, %s893_s30, %s888_s19  }
 0x20d PF: > { %p686_p4 = scmp.ge.s32.totalorder %s877_s15, 2  ;;  %s547_s5 = sand.u32 1, %s865_s12  }
 0x20e   : > { %p1202_p12 = scmp.ne.s32.totalorder %s1190_s24, 0  ;;  %s548_s25 = scalar_lea.sflag [#allocation4], %s547_s5 }
 0x210   : > { %p678_p0 = pnand %p686_p4, %p1202_p12 }
 0x212   : > { %860 = dma.done.wait (!%p678_p0), %s548_s25, 512  }
 0x213   : > { %862 = vsyncadd (!%p678_p0), %s548_s25, 4294966784  ;;  %p18_p7 = scmp.ge.s32.totalorder %s939_s18, 10   ;;  %s1203_s12 = smov %s869_s13 }
 0x214   : > { %s1204_s13 = smov %s873_s14  ;;  %s1205_s14 = smov %s951_s21 }
 0x215   : > { %s1206_s15 = smov %s939_s18  ;;  %20 = sbr.rel (!%p18_p7) target bundleno = 7 (0x7), region = 89 }
 0x21c   :  { %553 = vsyncpa [#allocation3], 1 }
 0x21d   :  { %555 = vsyncpa [#allocation3 + $0x1], 1 }
 0x21e   :  { %556 = vsyncpa [#allocation8], 1 }
 0x21f   :  { %558 = vsyncpa [#allocation8 + $0x1], 1 }
 0x220   :  { %559 = vsyncpa [#allocation4], 1 }
 0x221   :  { %561 = vsyncpa [#allocation4 + $0x1], 1 }
 0x222   :  { %562 = vsyncpa [#allocation5], 1 }
 0x223   :  { %564 = vsyncpa [#allocation5 + $0x1], 1 }

</bundles_post_ra>
